<compile_context>
chip_gen: v6e
topology: v6e:2x2x1
jax: 0.10.0
libtpu: 0.0.40
codegen_flags: <defaults>
</compile_context>

<pallas_src>
import jax
import jax.numpy as jnp
from jax.experimental import pallas as pl
from jax.experimental.pallas import tpu as pltpu

NEG_SLOPE = 0.01   # nn.LeakyReLU default
BN_EPS = 1e-5      # nn.BatchNorm1d default
LANE = 128
SUBLANE = 8


def _round_up(n, m):
    return (n + m - 1) // m * m


def _leaky_relu(h):
    return jnp.where(h > 0, h, NEG_SLOPE * h)


def fcn_drop_kernel(x_ref,
                    w1_ref, c1_ref,
                    w2_ref, c2_ref,
                    w3_ref, b3_ref,
                    o_ref):
    """One batch tile: (TB, F) -> (TB, Cp). BN scales are pre-folded into W."""
    x = x_ref[...]                                               # (TB, F) bf16

    # fc1 (+ folded bn1 scale) -> shift -> LeakyReLU; dropout(eval) = identity
    h1 = jnp.dot(x, w1_ref[...], preferred_element_type=jnp.float32)
    h1 = _leaky_relu(h1 + c1_ref[...])                           # f32 (TB, H1)

    # fc2 (+ folded bn2 scale) -> shift -> LeakyReLU; dropout(eval) = identity
    h2 = jnp.dot(h1.astype(jnp.bfloat16), w2_ref[...],
                 preferred_element_type=jnp.float32)
    h2 = _leaky_relu(h2 + c2_ref[...])                           # f32 (TB, H2)

    # fc3 -- output feature dim is padded to a lane-dense multiple of 128.
    out = jnp.dot(h2.astype(jnp.bfloat16), w3_ref[...],
                  preferred_element_type=jnp.float32)
    o_ref[...] = (out + b3_ref[...]).astype(o_ref.dtype)         # (TB, Cp)


def prepare_params(params):
    """One-time layout prep: transpose, fold BN, bf16-cast, lane-pad output.

    Call once and reuse; this keeps all XLA transpose/fold/pad ops out of the
    per-forward hot path.
    """
    w1 = params["w1"].T                          # (F,  H1)
    w2 = params["w2"].T                          # (H1, H2)
    w3 = params["w3"].T                          # (H2, C)
    H1 = w1.shape[1]
    H2, C = w3.shape
    Cp = _round_up(C, LANE)

    inv1 = params["bn1_gamma"] / jnp.sqrt(params["bn1_var"] + BN_EPS)
    inv2 = params["bn2_gamma"] / jnp.sqrt(params["bn2_var"] + BN_EPS)
    # x @ (W * s) == (x @ W) * s  ->  fold the BN scale into the weights.
    w1 = w1 * inv1[None, :]
    w2 = w2 * inv2[None, :]
    c1 = (params["b1"] - params["bn1_mean"]) * inv1 + params["bn1_beta"]
    c2 = (params["b2"] - params["bn2_mean"]) * inv2 + params["bn2_beta"]

    # Lane-dense output: zero-pad class dim to a multiple of 128.
    w3 = jnp.pad(w3, ((0, 0), (0, Cp - C)))
    b3 = jnp.pad(params["b3"], (0, Cp - C))

    return {
        "w1": w1.astype(jnp.bfloat16),
        "w2": w2.astype(jnp.bfloat16),
        "w3": w3.astype(jnp.bfloat16),
        "c1": c1.reshape(1, H1).astype(jnp.float32),
        "c2": c2.reshape(1, H2).astype(jnp.float32),
        "b3": b3.reshape(1, Cp).astype(jnp.float32),
        "class_num": int(C),
    }


def fcn_drop_forward(x, prep, *, block_b=128):
    """x: (B, in_features) f32. prep: output of prepare_params()."""
    B, F = x.shape
    w1, w2, w3 = prep["w1"], prep["w2"], prep["w3"]
    c1, c2, b3 = prep["c1"], prep["c2"], prep["b3"]
    C = prep["class_num"]
    H1, H2, Cp = w1.shape[1], w2.shape[1], w3.shape[1]

    # Batch tiling: TB multiple of 8 (sublane); pad B up to a tile multiple.
    TB = min(block_b, _round_up(B, SUBLANE))
    Bp = _round_up(B, TB)
    xb = x.astype(jnp.bfloat16)
    if Bp != B:
        xb = jnp.pad(xb, ((0, Bp - B), (0, 0)))
    n_tiles = Bp // TB

    # Weights/biases stay VMEM-resident across grid steps (constant index_map).
    resident = lambda shape: pl.BlockSpec(shape, lambda i: (0, 0))

    flops = 2 * Bp * (F * H1 + H1 * H2 + H2 * Cp)
    bytes_accessed = (
        Bp * F * 2                                   # x (bf16)
        + (F * H1 + H1 * H2 + H2 * Cp) * 2           # weights (bf16)
        + (H1 + H2 + Cp) * 4                         # biases (f32)
        + Bp * Cp * 4                                # output (f32)
    )

    out = pl.pallas_call(
        fcn_drop_kernel,
        out_shape=jax.ShapeDtypeStruct((Bp, Cp), jnp.float32),
        grid_spec=pltpu.PrefetchScalarGridSpec(
            num_scalar_prefetch=0,
            grid=(n_tiles,),
            in_specs=[
                pl.BlockSpec((TB, F), lambda i: (i, 0)),    # x batch tile
                resident((F, H1)), resident((1, H1)),
                resident((H1, H2)), resident((1, H2)),
                resident((H2, Cp)), resident((1, Cp)),
            ],
            out_specs=pl.BlockSpec((TB, Cp), lambda i: (i, 0)),
        ),
        compiler_params=pltpu.CompilerParams(
            dimension_semantics=("parallel",)),
        cost_estimate=pl.CostEstimate(
            flops=flops, transcendentals=0, bytes_accessed=bytes_accessed),
    )(xb, w1, c1, w2, c2, w3, b3)

    return out[:B, :C]


def init_params(key, in_features, class_num):
    """Deterministic synthetic init with PyTorch-default-like shapes."""
    F, H1, H2, C = in_features, 2 * in_features, 4 * in_features, class_num
    ks = jax.random.split(key, 6)

    def uniform(k, shape, fan_in):
        bound = 1.0 / jnp.sqrt(fan_in)
        return jax.random.uniform(k, shape, jnp.float32, -bound, bound)

    return {
        # nn.Linear weights are (out, in)
        "w1": uniform(ks[0], (H1, F), F),   "b1": uniform(ks[1], (H1,), F),
        "w2": uniform(ks[2], (H2, H1), H1), "b2": uniform(ks[3], (H2,), H1),
        "w3": uniform(ks[4], (C, H2), H2),  "b3": uniform(ks[5], (C,), H2),
        # BatchNorm1d fresh state: gamma=1, beta=0, running_mean=0, running_var=1
        "bn1_gamma": jnp.ones((H1,), jnp.float32),
        "bn1_beta": jnp.zeros((H1,), jnp.float32),
        "bn1_mean": jnp.zeros((H1,), jnp.float32),
        "bn1_var": jnp.ones((H1,), jnp.float32),
        "bn2_gamma": jnp.ones((H2,), jnp.float32),
        "bn2_beta": jnp.zeros((H2,), jnp.float32),
        "bn2_mean": jnp.zeros((H2,), jnp.float32),
        "bn2_var": jnp.ones((H2,), jnp.float32),
    }


def reference_forward(x, params):
    """Pure-JAX f32 reference of the eval-mode PyTorch forward."""
    h = x @ params["w1"].T + params["b1"]
    h = (h - params["bn1_mean"]) / jnp.sqrt(params["bn1_var"] + BN_EPS)
    h = h * params["bn1_gamma"] + params["bn1_beta"]
    h = jnp.where(h > 0, h, NEG_SLOPE * h)
    h = h @ params["w2"].T + params["b2"]
    h = (h - params["bn2_mean"]) / jnp.sqrt(params["bn2_var"] + BN_EPS)
    h = h * params["bn2_gamma"] + params["bn2_beta"]
    h = jnp.where(h > 0, h, NEG_SLOPE * h)
    return h @ params["w3"].T + params["b3"]


if __name__ == "__main__":
    B, IN_FEATURES, CLASS_NUM = 64, 32, 10

    key = jax.random.PRNGKey(0)
    kx, kp = jax.random.split(key)
    x = jax.random.normal(kx, (B, IN_FEATURES), dtype=jnp.float32)
    params = init_params(kp, IN_FEATURES, CLASS_NUM)

    prep = prepare_params(params)          # one-time layout / BN-fold work
    out = fcn_drop_forward(x, prep, block_b=32)   # grid = (2,), pipelined
    out = jax.block_until_ready(out)

    ref = reference_forward(x, params)
    assert out.shape == (B, CLASS_NUM), out.shape
    # bf16 MXU operands vs. f32 reference -> loosened tolerance.
    err = float(jnp.max(jnp.abs(out - ref)))
    assert jnp.allclose(out, ref, atol=5e-2, rtol=5e-2), f"max abs err {err}"

    print("KERNEL_OK")
</pallas_src>

<mosaic_0001>
module attributes {stable_mosaic.version = 11 : i64} {
  func.func @fcn_drop_kernel(%arg0: i32, %arg1: memref<32x32xbf16, #tpu.memory_space<vmem>>, %arg2: memref<32x64xbf16, #tpu.memory_space<vmem>>, %arg3: memref<1x64xf32, #tpu.memory_space<vmem>>, %arg4: memref<64x128xbf16, #tpu.memory_space<vmem>>, %arg5: memref<1x128xf32, #tpu.memory_space<vmem>>, %arg6: memref<128x128xbf16, #tpu.memory_space<vmem>>, %arg7: memref<1x128xf32, #tpu.memory_space<vmem>>, %arg8: memref<32x128xf32, #tpu.memory_space<vmem>>) attributes {dimension_semantics = [#tpu.dimension_semantics<parallel>], iteration_bounds = array<i64: 2>, scalar_prefetch = 0 : i64, scratch_operands = 0 : i64, tpu.core_type = #tpu.core_type<tc>, window_params = [{transform_indices = @transform_0, window_bounds = array<i64: 32, 32>}, {pipeline_mode = #tpu.pipeline_mode<synchronous>, transform_indices = @transform_1, window_bounds = array<i64: 32, 64>}, {pipeline_mode = #tpu.pipeline_mode<synchronous>, transform_indices = @transform_2, window_bounds = array<i64: 1, 64>}, {pipeline_mode = #tpu.pipeline_mode<synchronous>, transform_indices = @transform_3, window_bounds = array<i64: 64, 128>}, {pipeline_mode = #tpu.pipeline_mode<synchronous>, transform_indices = @transform_4, window_bounds = array<i64: 1, 128>}, {pipeline_mode = #tpu.pipeline_mode<synchronous>, transform_indices = @transform_5, window_bounds = array<i64: 128, 128>}, {pipeline_mode = #tpu.pipeline_mode<synchronous>, transform_indices = @transform_6, window_bounds = array<i64: 1, 128>}, {transform_indices = @transform_7, window_bounds = array<i64: 32, 128>}]} {
    %c0 = arith.constant 0 : index
    %c0_0 = arith.constant 0 : index
    %0 = vector.load %arg1[%c0, %c0_0] : memref<32x32xbf16, #tpu.memory_space<vmem>>, vector<32x32xbf16>
    %c0_1 = arith.constant 0 : index
    %c0_2 = arith.constant 0 : index
    %1 = vector.load %arg2[%c0_1, %c0_2] : memref<32x64xbf16, #tpu.memory_space<vmem>>, vector<32x64xbf16>
    %cst = arith.constant dense<0.000000e+00> : vector<32x64xf32>
    %2 = tpu.matmul %0, %1, %cst {dimension_numbers = #tpu.dot_dimension_numbers<[1], [0], [0], [1], [0, 0, 1, 1], [], []>} : vector<32x32xbf16>, vector<32x64xbf16>, vector<32x64xf32> -> vector<32x64xf32>
    %c0_3 = arith.constant 0 : index
    %c0_4 = arith.constant 0 : index
    %3 = vector.load %arg3[%c0_3, %c0_4] : memref<1x64xf32, #tpu.memory_space<vmem>>, vector<1x64xf32>
    %4 = vector.broadcast %3 : vector<1x64xf32> to vector<32x64xf32>
    %5 = arith.addf %2, %4 : vector<32x64xf32>
    %cst_5 = arith.constant 0.000000e+00 : f32
    %6 = vector.broadcast %cst_5 : f32 to vector<32x64xf32>
    %7 = arith.cmpf ogt, %5, %6 : vector<32x64xf32>
    %cst_6 = arith.constant 0.00999999977 : f32
    %8 = vector.broadcast %cst_6 : f32 to vector<32x64xf32>
    %9 = arith.mulf %8, %5 : vector<32x64xf32>
    %10 = arith.select %7, %5, %9 : vector<32x64xi1>, vector<32x64xf32>
    %11 = arith.truncf %10 : vector<32x64xf32> to vector<32x64xbf16>
    %c0_7 = arith.constant 0 : index
    %c0_8 = arith.constant 0 : index
    %12 = vector.load %arg4[%c0_7, %c0_8] : memref<64x128xbf16, #tpu.memory_space<vmem>>, vector<64x128xbf16>
    %cst_9 = arith.constant dense<0.000000e+00> : vector<32x128xf32>
    %13 = tpu.matmul %11, %12, %cst_9 {dimension_numbers = #tpu.dot_dimension_numbers<[1], [0], [0], [1], [0, 0, 1, 1], [], []>} : vector<32x64xbf16>, vector<64x128xbf16>, vector<32x128xf32> -> vector<32x128xf32>
    %c0_10 = arith.constant 0 : index
    %c0_11 = arith.constant 0 : index
    %14 = vector.load %arg5[%c0_10, %c0_11] : memref<1x128xf32, #tpu.memory_space<vmem>>, vector<1x128xf32>
    %15 = vector.broadcast %14 : vector<1x128xf32> to vector<32x128xf32>
    %16 = arith.addf %13, %15 : vector<32x128xf32>
    %cst_12 = arith.constant 0.000000e+00 : f32
    %17 = vector.broadcast %cst_12 : f32 to vector<32x128xf32>
    %18 = arith.cmpf ogt, %16, %17 : vector<32x128xf32>
    %cst_13 = arith.constant 0.00999999977 : f32
    %19 = vector.broadcast %cst_13 : f32 to vector<32x128xf32>
    %20 = arith.mulf %19, %16 : vector<32x128xf32>
    %21 = arith.select %18, %16, %20 : vector<32x128xi1>, vector<32x128xf32>
    %22 = arith.truncf %21 : vector<32x128xf32> to vector<32x128xbf16>
    %c0_14 = arith.constant 0 : index
    %c0_15 = arith.constant 0 : index
    %23 = vector.load %arg6[%c0_14, %c0_15] : memref<128x128xbf16, #tpu.memory_space<vmem>>, vector<128x128xbf16>
    %cst_16 = arith.constant dense<0.000000e+00> : vector<32x128xf32>
    %24 = tpu.matmul %22, %23, %cst_16 {dimension_numbers = #tpu.dot_dimension_numbers<[1], [0], [0], [1], [0, 0, 1, 1], [], []>} : vector<32x128xbf16>, vector<128x128xbf16>, vector<32x128xf32> -> vector<32x128xf32>
    %c0_17 = arith.constant 0 : index
    %c0_18 = arith.constant 0 : index
    %25 = vector.load %arg7[%c0_17, %c0_18] : memref<1x128xf32, #tpu.memory_space<vmem>>, vector<1x128xf32>
    %26 = vector.broadcast %25 : vector<1x128xf32> to vector<32x128xf32>
    %27 = arith.addf %24, %26 : vector<32x128xf32>
    %c0_19 = arith.constant 0 : index
    %c0_20 = arith.constant 0 : index
    %28 = vector.load %arg8[%c0_19, %c0_20] : memref<32x128xf32, #tpu.memory_space<vmem>>, vector<32x128xf32>
    tpu.vector_store %arg8[%c0_19, %c0_20], %27 {strides = array<i32>} : memref<32x128xf32, #tpu.memory_space<vmem>>, vector<32x128xf32>,
    return
  }
  func.func @transform_0(%arg0: i32) -> (i32, i32) {
    %c0_i32 = arith.constant 0 : i32
    %c0_i32_0 = arith.constant 0 : i32
    return %arg0, %c0_i32 : i32, i32
  }
  func.func @transform_1(%arg0: i32) -> (i32, i32) {
    %c0_i32 = arith.constant 0 : i32
    %c0_i32_0 = arith.constant 0 : i32
    %c0_i32_1 = arith.constant 0 : i32
    return %c0_i32, %c0_i32_0 : i32, i32
  }
  func.func @transform_2(%arg0: i32) -> (i32, i32) {
    %c0_i32 = arith.constant 0 : i32
    %c0_i32_0 = arith.constant 0 : i32
    %c0_i32_1 = arith.constant 0 : i32
    return %c0_i32, %c0_i32_0 : i32, i32
  }
  func.func @transform_3(%arg0: i32) -> (i32, i32) {
    %c0_i32 = arith.constant 0 : i32
    %c0_i32_0 = arith.constant 0 : i32
    %c0_i32_1 = arith.constant 0 : i32
    return %c0_i32, %c0_i32_0 : i32, i32
  }
  func.func @transform_4(%arg0: i32) -> (i32, i32) {
    %c0_i32 = arith.constant 0 : i32
    %c0_i32_0 = arith.constant 0 : i32
    %c0_i32_1 = arith.constant 0 : i32
    return %c0_i32, %c0_i32_0 : i32, i32
  }
  func.func @transform_5(%arg0: i32) -> (i32, i32) {
    %c0_i32 = arith.constant 0 : i32
    %c0_i32_0 = arith.constant 0 : i32
    %c0_i32_1 = arith.constant 0 : i32
    return %c0_i32, %c0_i32_0 : i32, i32
  }
  func.func @transform_6(%arg0: i32) -> (i32, i32) {
    %c0_i32 = arith.constant 0 : i32
    %c0_i32_0 = arith.constant 0 : i32
    %c0_i32_1 = arith.constant 0 : i32
    return %c0_i32, %c0_i32_0 : i32, i32
  }
  func.func @transform_7(%arg0: i32) -> (i32, i32) {
    %c0_i32 = arith.constant 0 : i32
    %c0_i32_0 = arith.constant 0 : i32
    return %arg0, %c0_i32 : i32, i32
  }
}

</mosaic_0001>

<bundles_post_ra>
// kernel: tpu_custom_call.1
= control target key start
LH: loop header
LB: loop body
LE: loop exit
PB: predicated region body
PF: predicated region fallthrough
CT: control target
= control target key end

     0   :  { %12 = vsyncpa [#allocation3], 0  ;;  %s1176_s0 = inlined_call_operand.vmem [shape: bf16[64,32], index: 0, kind: input, shape index: {}]   ;;  %s1177_s1 = inlined_call_operand.vmem [shape: bf16[32,64], index: 1, kind: input, shape index: {}]   ;;  %s1178_s2 = inlined_call_operand.vmem [shape: f32[1,64], index: 2, kind: input, shape index: {}]   ;;  %s1179_s3 = inlined_call_operand.vmem [shape: bf16[64,128], index: 3, kind: input, shape index: {}]   ;;  %s1180_s4 = inlined_call_operand.vmem [shape: f32[1,128], index: 4, kind: input, shape index: {}]   ;;  %s1181_s5 = inlined_call_operand.hbm [shape: bf16[128,128], index: 5, kind: input, shape index: {}]   ;;  %s1182_s6 = inlined_call_operand.vmem [shape: f32[1,128], index: 6, kind: input, shape index: {}]   ;;  %s1183_s7 = inlined_call_operand.hbm [shape: f32[64,128], index: 7, kind: output, shape index: {}]  }
   0x1   :  { %13 = vsyncpa [#allocation4], 0 }
   0x2   :  { %15 = vsyncpa [#allocation4 + $0x1], 0  ;;  %s1030_s24 = smov 0   ;;  %s1032_s25 = smov 0  }
   0x3   :  { %s1034_s26 = smov 0   ;;  %s1036_s27 = smov 0  }
   0x4 LB: > { %s1051_s28 = sadd.s32 4294967295, %s982_s27   ;;  %s724_s29 = sadd.s32 4294967294, %s982_s27   ;;  %s982_s27 = sphi %s1036_s27, %s1191_s27   ;;  %s978_s26 = sphi %s1034_s26, %s1190_s26   ;;  %s974_s25 = sphi %s1032_s25, %s1189_s25   ;;  %s970_s24 = sphi %s1030_s24, %s1188_s24  }
   0x5   : > { %s1055_s30 = sadd.s32 1, %s982_s27   ;;  %s180_s8 = sadd.s32 1, %s978_s26 }
   0x6   : > { %s177_s9 = ssub.s32 %s982_s27, %s1055_s30  ;;  %p190_p0 = scmp.ne.s32.totalorder %s978_s26, %s974_s25 }
   0x7   : > { %p178_p1 = scmp.eq.s32.totalorder %s177_s9, 0  ;;  %p191_p2 = scmp.eq.s32.totalorder %s1051_s28, 1 }
   0x8   : > { %p196_p3 = scmp.ne.s32.totalorder %s974_s25, %s970_s24  ;;  %p197_p4 = scmp.eq.s32.totalorder %s724_s29, 1 }
   0x9   : > { %s1066_s10 = scalar_select %p178_p1, %s978_s26, %s180_s8  }
   0xa   : > { %p1068_p5 = por %p191_p2, %p190_p0  ;;  %p1072_p6 = por %p197_p4, %p196_p3 }
   0xb   : > { %p725_p7 = scmp.ge.s32.totalorder %s982_s27, 1  ;;  %p204_p8 = scmp.lt.s32.totalorder %s982_s27, 3 }
   0xc   : > { %s1185_s12 = scalar_select %p1072_p6, 1, 0 }
   0xd   : > { %p836_p9 = scmp.eq.s32.totalorder %s1051_s28, 0  ;;  %p1079_p10 = pnand %p725_p7, %p204_p8 }
   0xe   : > { %s984_s14 = smov [#allocation2]  }
   0xf   : > { %s228_s15 = sshll.u32 %s984_s14, 4  ;;  %p828_p11 = pneg %p1079_p10  ;;  %s229_s15 = int_to_ptr.vmem [resolvable:$true] %s228_s15 }
  0x10   : > { %s903_s16 = scalar_lea.vmem %s229_s15, 1024  ;;  %p911_p3 = scmp.lt.s32.totalorder %s229_s15, %s229_s15 }
  0x11   : > { %p829_p12 = pnand %p836_p9, %p828_p11  ;;  %p904_p0 = scmp.ne.s32.totalorder %s229_s15, %s903_s16 }
  0x12   : > { %p912_p4 = scmp.lt.s32.totalorder %s903_s16, %s903_s16 }
  0x13   : > { %p894_p13 = pneg %p829_p12 }
  0x14   : > { %p913_p6 = por %p912_p4, %p911_p3 }
  0x15   : > { %p906_p1 = pnand %p904_p0, %p894_p13 }
  0x17   : > { %p907_p2 = pneg %p906_p1 }
  0x19   : > { %p914_p7 = pnand %p913_p6, %p907_p2 }
  0x1b   : > { %917 = shalt.err (!%p914_p7)
}
  0x1c   : > { %s985_s17 = smov 64   ;;  %s986_s18 = smov 4  }
  0x1d   : > { %831 = dma.hbm_to_vmem [thread:$0]  (!%p829_p12), %s1181_s5, 1024, %s229_s15, [#allocation3], %s985_s17, %s985_s17, %s986_s18  }
  0x1e   : > { %256 = sbr.rel (%p1079_p10) target bundleno = 674 (0x2a2), region = 48 }
  0x23   : > { %961 = dma.done.wait (%p836_p9), [#allocation3], 1024  }
  0x24   : > { %963 = vsyncadd (%p836_p9), [#allocation3], 4294966272  ;;  %s731_s21 = sshll.u32 %s1051_s28, 2  ;;  %v876_v0 = vld [vmem:[%s1177_s1 + $0x8] sm:$0xff]   ;;  %v877_v1 = vld [vmem:[%s1177_s1] sm:$0xff]   ;;  %vm333_vm0 = vcmask 261120  }
  0x25   : > { %p289_p8 = scmp.lt.s32.totalorder %s731_s21, 7  ;;  %782 = vmatprep.subr.bf16.mxu1 %v876_v0  ;;  %v880_v4 = vld [vmem:[%s1179_s3 + $0x18] sm:$0xff]   ;;  %v881_v5 = vld [vmem:[%s1179_s3 + $0x10] sm:$0xff]   ;;  %v882_v6 = vld [vmem:[%s1179_s3 + $0x8] sm:$0xff]   ;;  %vm442_vm5 = vcmask 523264   ;;  %s285_s13 = sand.u32 1, %s974_s25  }
  0x26   : > { %783 = vmatpush3.bf16.msra.mxu1 %v876_v0  ;;  %v883_v7 = vld [vmem:[%s1179_s3] sm:$0xff]   ;;  %v884_v8 = vld [vmem:[#allocation2 + $0x38] sm:$0xff]   ;;  %v885_v9 = vld [vmem:[#allocation2 + $0x30] sm:$0xff]   ;;  %s730_s15 = sshll.u32 %s285_s13, 5  ;;  %s761_s20 = sshll.u32 %s1051_s28, 9 }
  0x27   : > { %s1193_s21 = smov (!%p289_p8, %s731_s21), 7  ;;  %784 = vmatprep.subr.bf16.mxu1 %v877_v1  ;;  %802 = vmatprep.subr.bf16.mxu0 %v884_v8  ;;  %v886_v10 = vld [vmem:[#allocation2 + $0x28] sm:$0xff]   ;;  %v887_v11 = vld [vmem:[#allocation2 + $0x20] sm:$0xff]   ;;  %v888_v12 = vld [vmem:[#allocation2 + $0x18] sm:$0xff]   ;;  %s287_s18 = scalar_lea.vmem [#allocation5], %s730_s15 }
  0x28   : > { %s732_s22 = sshll.u32 %s1193_s21, 2  ;;  %803 = vmatpush3.bf16.msra.mxu0 %v884_v8  ;;  %v733_v14 = vld [vmem:[%s1178_s2] ss:$0 sm:$0xff]  ;;  %v889_v32 = vld [vmem:[#allocation2 + $0x10] sm:$0xff]   ;;  %v890_v33 = vld [vmem:[#allocation2 + $0x8] sm:$0xff]   ;;  %s650_s19 = sshll.u32 %s287_s18, 4  ;;  %s1129_s19 = int_to_ptr.vmem [resolvable:$true] %s650_s19 }
  0x29   : > { %s292_s8 = scalar_lea.vmem %s1176_s0, %s732_s22  ;;  %804 = vmatprep.subr.bf16.mxu0 %v885_v9  ;;  %v891_v34 = vld [vmem:[#allocation2] sm:$0xff]   ;;  %s1134_s23 = scalar_lea.hbm %s1183_s7, %s761_s20 }
  0x2a   : > { %v878_v2 = vld [vmem:[%s292_s8] sm:$0xff]   ;;  %v879_v3 = vld [vmem:[%s292_s8 + $0x8] sm:$0xff]   ;;  %785 = vmatpush3.bf16.msra.mxu1 %v877_v1  ;;  %s1136_s29 = scalar_lea.sflag [#allocation4], %s285_s13  ;;  %s918_s28 = scalar_lea.vmem %s1129_s19, 512 }
  0x2b   : > { %786 = vmatprep.mubr.msk.bf16.mxu1 %vm333_vm0, %v878_v2  ;;  %790 = vmatprep.subr.bf16.mxu1 %v880_v4  ;;  %v740_v36 = vld [vmem:[%s1180_s4] ss:$0 sm:$0xff]  ;;  %p919_p6 = scmp.ne.s32.totalorder %s1129_s19, %s918_s28  ;;  %s987_s8 = smov [#allocation5]  }
  0x2c   : > { %805 = vmatpush3.bf16.msra.mxu0 %v885_v9  ;;  %v747_v54 = vld [vmem:[%s1182_s6] ss:$0 sm:$0xff]  ;;  %s922_s9 = sshll.u32 %s987_s8, 4  ;;  %s923_s9 = int_to_ptr.vmem [resolvable:$false] %s922_s9 }
  0x2d   : > { %787 = vmatmul.mubr.msk.bf16.vlgmr.msra.gmra.mxu1 %vm333_vm0, %v879_v3  ;;  %806 = vmatprep.subr.bf16.mxu0 %v886_v10  ;;  %p920_p9 = pnand %p919_p6, %p1068_p5  ;;  %s924_s14 = scalar_lea.vmem %s923_s9, 1024 }
  0x2e   : > { %791 = vmatpush3.bf16.msra.mxu1 %v880_v4  ;;  %p925_p11 = scmp.lt.s32.totalorder %s1129_s19, %s923_s9  ;;  %p926_p12 = scmp.lt.s32.totalorder %s924_s14, %s918_s28 }
  0x2f   : > { %792 = vmatprep.subr.bf16.mxu1 %v881_v5  ;;  %p921_p10 = pneg %p920_p9 }
  0x30   : > { %807 = vmatpush3.bf16.msra.mxu0 %v886_v10  ;;  %p927_p13 = por %p926_p12, %p925_p11 }
  0x31   : > { %808 = vmatprep.subr.bf16.mxu0 %v887_v11 }
  0x32   : > { %793 = vmatpush3.bf16.msra.mxu1 %v881_v5  ;;  %p928_p0 = pnand %p927_p13, %p921_p10 }
  0x33   : > { %794 = vmatprep.subr.bf16.mxu1 %v882_v6 }
  0x34   : > { %809 = vmatpush3.bf16.msra.mxu0 %v887_v11 }
  0x35   : > { %810 = vmatprep.subr.bf16.mxu0 %v888_v12 }
  0x36   : > { %795 = vmatpush3.bf16.msra.mxu1 %v882_v6 }
  0x37   : > { %796 = vmatprep.subr.bf16.mxu1 %v883_v7 }
  0x38   : > { %811 = vmatpush3.bf16.msra.mxu0 %v888_v12 }
  0x39   : > { %812 = vmatprep.subr.bf16.mxu0 %v889_v32 }
  0x3a   : > { %797 = vmatpush3.bf16.msra.mxu1 %v883_v7 }
  0x3c   : > { %813 = vmatpush3.bf16.msra.mxu0 %v889_v32 }
  0x3d   : > { %814 = vmatprep.subr.bf16.mxu0 %v890_v33 }
  0x40   : > { %815 = vmatpush3.bf16.msra.mxu0 %v890_v33 }
  0x41   : > { %816 = vmatprep.subr.bf16.mxu0 %v891_v34 }
  0x44   : > { %817 = vmatpush3.bf16.msra.mxu0 %v891_v34 }
  0xed   : > { %v788_v13 = vpop.f32.mrf.mxu1 }
  0xee   : > { %v383_v17 = vadd.f32 %v788_v13, %v733_v14 }
  0xef   : > { %v374_v15 = vpop.f32.mrf.mxu1 }
  0xf0   : > { %v375_v16 = vadd.f32 %v733_v14, %v374_v15  ;;  %v395_v24 = vmul.f32 0.01, %v383_v17  ;;  %vm391_vm3 = vcmp.gt.f32.partialorder %v383_v17, 0.0 }
  0xf1   : > { %v789_v18 = vpop.f32.mrf.mxu1 }
  0xf2   : > { %v386_v19 = vadd.f32 %v789_v18, %v733_v14  ;;  %v393_v21 = vmul.f32 0.01, %v375_v16  ;;  %vm389_vm2 = vcmp.gt.f32.partialorder %v375_v16, 0.0  ;;  %v399_v29 = vsel %vm391_vm3, %v383_v17, %v395_v24 }
  0xf3   : > { %v377_v20 = vpop.f32.mrf.mxu1 }
  0xf4   : > { %vm392_vm1 = vcmp.gt.f32.partialorder %v386_v19, 0.0  ;;  %v396_v22 = vmul.f32 0.01, %v386_v19  ;;  %v378_v23 = vadd.f32 %v733_v14, %v377_v20  ;;  %v397_v27 = vsel %vm389_vm2, %v375_v16, %v393_v21 }
  0xf6   : > { %vm390_vm4 = vcmp.gt.f32.partialorder %v378_v23, 0.0  ;;  %v394_v25 = vmul.f32 0.01, %v378_v23  ;;  %v400_v26 = vsel %vm392_vm1, %v386_v19, %v396_v22 }
  0xf7   : > { %v402_v31 = vpack.c.bf16 %v400_v26, %v399_v29 }
  0xf8   : > { %v398_v28 = vsel %vm390_vm4, %v378_v23, %v394_v25 }
  0xf9   : > { %v401_v30 = vpack.c.bf16 %v398_v28, %v397_v27 }
  0xfb   : > { %798 = vmatprep.mubr.msk.bf16.mxu1 %vm442_vm5, %v401_v30 }
  0xfc   : > { %799 = vmatmul.mubr.msk.bf16.vlgmr.msra.gmra.mxu1 %vm442_vm5, %v402_v31 }
 0x1bc   : > { %v800_v35 = vpop.f32.mrf.mxu1 }
 0x1bd   : > { %v492_v39 = vadd.f32 %v800_v35, %v740_v36 }
 0x1be   : > { %v483_v37 = vpop.f32.mrf.mxu1 }
 0x1bf   : > { %v484_v38 = vadd.f32 %v740_v36, %v483_v37  ;;  %v504_v46 = vmul.f32 0.01, %v492_v39  ;;  %vm500_vm8 = vcmp.gt.f32.partialorder %v492_v39, 0.0 }
 0x1c0   : > { %v801_v40 = vpop.f32.mrf.mxu1 }
 0x1c1   : > { %v495_v41 = vadd.f32 %v801_v40, %v740_v36  ;;  %v502_v43 = vmul.f32 0.01, %v484_v38  ;;  %vm498_vm7 = vcmp.gt.f32.partialorder %v484_v38, 0.0  ;;  %v508_v52 = vsel %vm500_vm8, %v492_v39, %v504_v46 }
 0x1c2   : > { %v486_v42 = vpop.f32.mrf.mxu1 }
 0x1c3   : > { %vm501_vm6 = vcmp.gt.f32.partialorder %v495_v41, 0.0  ;;  %v505_v44 = vmul.f32 0.01, %v495_v41  ;;  %v487_v45 = vadd.f32 %v740_v36, %v486_v42  ;;  %v506_v49 = vsel %vm498_vm7, %v484_v38, %v502_v43 }
 0x1c5   : > { %v503_v47 = vmul.f32 0.01, %v487_v45  ;;  %vm499_vm9 = vcmp.gt.f32.partialorder %v487_v45, 0.0  ;;  %v509_v48 = vsel %vm501_vm6, %v495_v41, %v505_v44 }
 0x1c6   : > { %v511_v53 = vpack.c.bf16 %v509_v48, %v508_v52 }
 0x1c7   : > { %v507_v50 = vsel %vm499_vm9, %v487_v45, %v503_v47 }
 0x1c8   : > { %v510_v51 = vpack.c.bf16 %v507_v50, %v506_v49 }
 0x1ca   : > { %818 = vmatprep.mubr.bf16.mxu0 %v510_v51 }
 0x1cb   : > { %819 = vmatmul.mubr.bf16.vlgmr.msra.gmra.mxu0 %v511_v53 }
 0x28b   : > { %v820_v55 = vpop.f32.mrf.mxu0 }
 0x28c   : > { %v626_v56 = vadd.f32 %v820_v55, %v747_v54 }
 0x28d   : > { %v617_v57 = vpop.f32.mrf.mxu0 }
 0x28e   : > { %634 = vst [vmem:[%s287_s18 + $0x10] sm:$0xff] %v626_v56  ;;  %v618_v58 = vadd.f32 %v747_v54, %v617_v57 }
 0x28f   : > { %v821_v59 = vpop.f32.mrf.mxu0 }
 0x290   : > { %632 = vst [vmem:[%s287_s18] sm:$0xff] %v618_v58  ;;  %v629_v60 = vadd.f32 %v821_v59, %v747_v54 }
 0x291   : > { %v620_v61 = vpop.f32.mrf.mxu0 }
 0x292   : > { %635 = vst [vmem:[%s287_s18 + $0x18] sm:$0xff] %v629_v60  ;;  %v621_v62 = vadd.f32 %v747_v54, %v620_v61 }
 0x294   : > { %633 = vst [vmem:[%s287_s18 + $0x8] sm:$0xff] %v621_v62 }
 0x295   : > { %931 = shalt.err (!%p928_p0)
}
 0x296   : > { %s932_s13 = scalar_lea.hbm %s1134_s23, 512  ;;  %s936_s17 = scalar_lea.hbm %s1183_s7, 1024 }
 0x297   : > { %p933_p1 = scmp.ne.s32.totalorder %s1134_s23, %s932_s13  ;;  %p937_p4 = scmp.lt.s32.totalorder %s1134_s23, %s1183_s7 }
 0x298   : > { %p938_p7 = scmp.lt.s32.totalorder %s936_s17, %s932_s13 }
 0x299   : > { %p934_p2 = pnand %p933_p1, %p1068_p5 }
 0x29a   : > { %p939_p8 = por %p938_p7, %p937_p4 }
 0x29b   : > { %p935_p3 = pneg %p934_p2 }
 0x29d   : > { %p940_p6 = pnand %p939_p8, %p935_p3 }
 0x29f   : > { %943 = shalt.err (!%p940_p6)
}
 0x2a0   : > { %s988_s21 = smov 128   ;;  %s989_s22 = smov 8  }
 0x2a1   : > { %826 = dma.vmem_to_hbm [thread:$0]  (%p1068_p5), %s1129_s19, 512, %s1134_s23, %s1136_s29, %s988_s21, %s988_s21, %s989_s22  }
 0x2a2 PF: > { %p838_p9 = scmp.ge.s32.totalorder %s982_s27, 2  ;;  %s665_s28 = sand.u32 1, %s970_s24  }
 0x2a3   : > { %p1187_p10 = scmp.ne.s32.totalorder %s1185_s12, 0  ;;  %s666_s8 = scalar_lea.sflag [#allocation4], %s665_s28 }
 0x2a5   : > { %p833_p11 = pnand %p838_p9, %p1187_p10 }
 0x2a7   : > { %p834_p12 = pneg %p833_p11 }
 0x2a9   : > { %965 = dma.done.wait (%p834_p12), %s666_s8, 512  }
 0x2aa   : > { %967 = vsyncadd (%p834_p12), %s666_s8, 4294966784  ;;  %p18_p13 = scmp.ge.s32.totalorder %s1055_s30, 4   ;;  %s1188_s24 = smov %s974_s25 }
 0x2ab   : > { %s1189_s25 = smov %s978_s26  ;;  %s1190_s26 = smov %s1066_s10 }
 0x2ac   : > { %s1191_s27 = smov %s1055_s30  ;;  %20 = sbr.rel (!%p18_p13) target bundleno = 4 (0x4), region = 88 }
 0x2b1   :  { %671 = vsyncpa [#allocation3], 1 }
 0x2b2   :  { %673 = vsyncpa [#allocation3 + $0x1], 1 }
 0x2b3   :  { %674 = vsyncpa [#allocation4], 1 }
 0x2b4   :  { %676 = vsyncpa [#allocation4 + $0x1], 1 }

</bundles_post_ra>
